<compile_context>
chip_gen: v7x
topology: tpu7x:2x2x1
jax: 0.10.0
libtpu: 0.0.40
codegen_flags: <defaults>
</compile_context>

<pallas_src>
from itertools import permutations

import numpy as np
import jax
import jax.numpy as jnp
from jax import lax
from jax.experimental import pallas as pl
from jax.experimental.pallas import tpu as pltpu


# ---------------------------------------------------------------------------
# Fused kernel: head/tail MLP + linear terms + bilinear, one grid step
# ---------------------------------------------------------------------------
def make_fused_kernel(BS, H, OUT):
    NT = (((1,), (1,)), ((), ()))
    bf16 = jnp.bfloat16

    def kernel(x_ref, w1_ref, b1_ref, w2_ref, b2_ref, wl_ref, wa_ref,
               bil_ref, lin_ref, bd_scr):
        # ---- fused head/tail MLP (bf16 operands, f32 accumulate) ----
        # TODO(synk): Dropout(0.1) omitted (eval-mode identity).
        h1 = jnp.maximum(
            jnp.dot(x_ref[...], w1_ref[...],
                    preferred_element_type=jnp.float32) + b1_ref[...], 0.0)
        ht = (jnp.dot(h1.astype(bf16), w2_ref[...],
                      preferred_element_type=jnp.float32) + b2_ref[...])
        htb = ht.astype(bf16)                          # (BS, 2H)
        head = htb[:, :H]                              # (BS, H)
        tail = htb[:, H:]                              # (BS, H)

        # ---- linear terms: [head @ wlh | tail @ wlt] in one matmul ----
        lin_ref[...] = jnp.dot(htb, wl_ref[...],
                               preferred_element_type=jnp.float32)   # (BS, 2*OUT)

        # ---- bilinear as ONE lane-dense MXU matmul ----
        # hw[r, o*H + l] = sum_k head[r, k] * wb[o, k, l]
        hw = jnp.dot(head, wa_ref[...],
                     preferred_element_type=jnp.float32).astype(bf16)  # (BS, OUT*H)

        # block-diagonal RHS in VMEM scratch: bd[o*BS + c, o*H + l] = tail[c, l]
        bd_scr[...] = jnp.zeros(bd_scr.shape, bd_scr.dtype)
        for o in range(OUT):        # OUT small static sub-block stores
            bd_scr[o * BS:(o + 1) * BS, o * H:(o + 1) * H] = tail

        # bil[r, o*BS + c] = sum_l hw[r, o*H + l] * tail[c, l]
        bil_ref[...] = lax.dot_general(hw, bd_scr[...], NT,
                                       preferred_element_type=jnp.float32)
    return kernel


# ---------------------------------------------------------------------------
# Weight pre-processing (pure JAX, done ONCE at parameter-load time)
# ---------------------------------------------------------------------------
def prepare_params(params):
    bf16 = jnp.bfloat16
    _, H = params["w1h"].shape
    OUT = params["bb"].shape[1]
    f32 = params["w2h"].dtype
    zH = jnp.zeros((H, H), f32)
    zL = jnp.zeros((H, OUT), f32)
    return {
        # fused first layer: [x@w1h | x@w1t]
        "w1": jnp.concatenate([params["w1h"], params["w1t"]], axis=1).astype(bf16),
        "b1": jnp.concatenate([params["b1h"], params["b1t"]], axis=1),
        # block-diagonal second layer keeps the two branches independent
        "w2": jnp.concatenate(
            [jnp.concatenate([params["w2h"], zH], axis=1),
             jnp.concatenate([zH, params["w2t"]], axis=1)], axis=0).astype(bf16),
        "b2": jnp.concatenate([params["b2h"], params["b2t"]], axis=1),
        # block-diagonal linear head/tail: [head|tail] @ wl -> [head@wlh | tail@wlt]
        "wl": jnp.concatenate(
            [jnp.concatenate([params["wlh"], zL], axis=1),
             jnp.concatenate([zL, params["wlt"]], axis=1)], axis=0).astype(bf16),
        # wa[k, o*h + l] = wb[o, k, l]  -> lane-dense bilinear matmul
        "wa": params["wb"].transpose(1, 0, 2).reshape(H, OUT * H).astype(bf16),
        # bilinear bias, added (exactly, in f32) in the fused epilogue
        "bb": params["bb"],                                     # (1, OUT)
    }


def run_fused(xf, prep, BS, H, OUT):
    IN = xf.shape[1]
    kernel = make_fused_kernel(BS, H, OUT)

    io_args = (xf, prep["w1"], prep["b1"], prep["w2"], prep["b2"],
               prep["wl"], prep["wa"])
    out_shape = (jax.ShapeDtypeStruct((BS, OUT * BS), jnp.float32),
                 jax.ShapeDtypeStruct((BS, 2 * OUT), jnp.float32))

    def full(a):
        return pl.BlockSpec(a.shape, lambda i: (0,) * a.ndim)

    io_bytes = sum(int(np.prod(a.shape)) * a.dtype.itemsize for a in io_args)
    out_bytes = sum(int(np.prod(s.shape)) * 4 for s in out_shape)
    scratch_bytes = OUT * BS * OUT * H * 2
    # double-buffered I/O blocks + resident scratch + headroom
    vmem_limit = int(2 * (io_bytes + out_bytes) + scratch_bytes + (1 << 20))

    flops = 2 * BS * (IN * 2 * H             # first MLP layer
                      + 2 * H * 2 * H        # second MLP layer
                      + 2 * H * 2 * OUT      # linear terms
                      + H * OUT * H          # head x wb contraction
                      + OUT * H * OUT * BS)  # bilinear vs blockdiag(tail)

    return pl.pallas_call(
        kernel,
        grid=(1,),
        in_specs=[full(a) for a in io_args],
        out_specs=(pl.BlockSpec((BS, OUT * BS), lambda i: (0, 0)),
                   pl.BlockSpec((BS, 2 * OUT), lambda i: (0, 0))),
        out_shape=out_shape,
        scratch_shapes=[pltpu.VMEM((OUT * BS, OUT * H), jnp.bfloat16)],
        compiler_params=pltpu.CompilerParams(
            dimension_semantics=("arbitrary",),
            vmem_limit_bytes=vmem_limit),
        cost_estimate=pl.CostEstimate(flops=flops, transcendentals=0,
                                      bytes_accessed=io_bytes + out_bytes),
    )(*io_args)


# ---------------------------------------------------------------------------
# Full forward (hot path in one Pallas kernel; epilogue is fused XLA glue)
# ---------------------------------------------------------------------------
def re_module_forward(x, positions, prep, perm_h, perm_t):
    B, S, IN = x.shape
    H = prep["w1"].shape[1] // 2
    OUT = prep["bb"].shape[1]
    BS = B * S

    xf = x.reshape(BS, IN).astype(jnp.bfloat16)
    bil, lin = run_fused(xf, prep, BS, H, OUT)       # (BS, OUT*BS), (BS, 2*OUT)

    # keep only the same-batch (diagonal) blocks of the cross-batch bilinear
    bil5 = bil.reshape(B, S, OUT, B, S)
    grid = bil5[jnp.arange(B), :, :, jnp.arange(B), :]       # (B, S, OUT, S)
    grid = grid.transpose(0, 1, 3, 2)                        # (B, S, S, OUT)

    lh = lin[:, :OUT].reshape(B, S, OUT)
    lt = lin[:, OUT:].reshape(B, S, OUT)

    # pair gather of the off-diagonal (i != j) entries + linear terms + bias
    biaffine = (grid[:, perm_h, perm_t]
                + lh[:, perm_h] + lt[:, perm_t] + prep["bb"])   # (B, P, OUT)

    pos = positions.reshape(B, S, 1)
    pos_out = jnp.concatenate((pos[:, perm_h], pos[:, perm_t]), axis=-1)
    return pos_out, biaffine


# ---------------------------------------------------------------------------
# Pure-JAX reference for verification
# ---------------------------------------------------------------------------
def ref_forward(x, positions, params, perm_h, perm_t):
    B, S, _ = x.shape

    def mlp(x2, w1, b1, w2, b2):
        h1 = jnp.maximum(x2 @ w1 + b1, 0.0)
        return h1 @ w2 + b2

    head = mlp(x, params["w1h"], params["b1h"], params["w2h"], params["b2h"])
    tail = mlp(x, params["w1t"], params["b1t"], params["w2t"], params["b2t"])
    hp, tp = head[:, perm_h], tail[:, perm_t]
    bil = jnp.einsum("bpi,oij,bpj->bpo", hp, params["wb"], tp) + params["bb"][0]
    lin = hp @ params["wlh"] + tp @ params["wlt"]
    pos = positions.reshape(B, -1, 1)
    pos_out = jnp.concatenate((pos[:, perm_h], pos[:, perm_t]), axis=-1)
    return pos_out, bil + lin


if __name__ == "__main__":
    B, S, IN, H, OUT = 2, 8, 16, 32, 8
    P = S * (S - 1)

    # static permutation index tables (same as zip(*permutations(range(S), 2)))
    pairs = list(permutations(range(S), 2))
    perm_h = jnp.array([p[0] for p in pairs], dtype=jnp.int32)
    perm_t = jnp.array([p[1] for p in pairs], dtype=jnp.int32)

    key = jax.random.PRNGKey(0)
    ks = jax.random.split(key, 12)
    f32 = jnp.float32
    params = {
        "w1h": jax.random.normal(ks[0], (IN, H), f32) / np.sqrt(IN),
        "b1h": jax.random.normal(ks[1], (1, H), f32) * 0.02,
        "w2h": jax.random.normal(ks[2], (H, H), f32) / np.sqrt(H),
        "b2h": jax.random.normal(ks[3], (1, H), f32) * 0.02,
        "w1t": jax.random.normal(ks[4], (IN, H), f32) / np.sqrt(IN),
        "b1t": jax.random.normal(ks[5], (1, H), f32) * 0.02,
        "w2t": jax.random.normal(ks[6], (H, H), f32) / np.sqrt(H),
        "b2t": jax.random.normal(ks[7], (1, H), f32) * 0.02,
        "wb":  jax.random.normal(ks[8], (OUT, H, H), f32) / H,
        "bb":  jax.random.normal(ks[9], (1, OUT), f32) * 0.02,
        "wlh": jax.random.normal(ks[10], (H, OUT), f32) / np.sqrt(2 * H),
        "wlt": jax.random.normal(ks[11], (H, OUT), f32) / np.sqrt(2 * H),
    }

    kx, _ = jax.random.split(jax.random.PRNGKey(42))
    x = jax.random.normal(kx, (B, S, IN), f32)
    positions = jnp.arange(B * S, dtype=f32).reshape(B, S)

    prep = prepare_params(params)            # hoisted: computed once, reused
    fwd = jax.jit(re_module_forward)

    pos_out, out = fwd(x, positions, prep, perm_h, perm_t)
    pos_out = jax.block_until_ready(pos_out)
    out = jax.block_until_ready(out)

    ref_pos, ref_out = ref_forward(x, positions, params, perm_h, perm_t)
    assert pos_out.shape == (B, P, 2) and out.shape == (B, P, OUT)
    np.testing.assert_allclose(np.asarray(pos_out), np.asarray(ref_pos),
                               rtol=1e-6, atol=1e-6)
    # bf16 matmul operands (f32 accumulation) vs f32 reference -> loosened tol
    np.testing.assert_allclose(np.asarray(out), np.asarray(ref_out),
                               rtol=5e-2, atol=8e-2)
    print("KERNEL_OK")
</pallas_src>

<mosaic_0001>
module attributes {stable_mosaic.version = 11 : i64} {
  func.func @kernel(%arg0: i32, %arg1: memref<16x16xbf16, #tpu.memory_space<vmem>>, %arg2: memref<16x64xbf16, #tpu.memory_space<vmem>>, %arg3: memref<1x64xf32, #tpu.memory_space<vmem>>, %arg4: memref<64x64xbf16, #tpu.memory_space<vmem>>, %arg5: memref<1x64xf32, #tpu.memory_space<vmem>>, %arg6: memref<64x16xbf16, #tpu.memory_space<vmem>>, %arg7: memref<32x256xbf16, #tpu.memory_space<vmem>>, %arg8: memref<16x128xf32, #tpu.memory_space<vmem>>, %arg9: memref<16x16xf32, #tpu.memory_space<vmem>>, %arg10: memref<128x256xbf16, #tpu.memory_space<vmem>>) attributes {dimension_semantics = [#tpu.dimension_semantics<arbitrary>], iteration_bounds = array<i64: 1>, scalar_prefetch = 0 : i64, scratch_operands = 1 : i64, tpu.core_type = #tpu.core_type<tc>, window_params = [{pipeline_mode = #tpu.pipeline_mode<synchronous>, transform_indices = @transform_0, window_bounds = array<i64: 16, 16>}, {pipeline_mode = #tpu.pipeline_mode<synchronous>, transform_indices = @transform_1, window_bounds = array<i64: 16, 64>}, {pipeline_mode = #tpu.pipeline_mode<synchronous>, transform_indices = @transform_2, window_bounds = array<i64: 1, 64>}, {pipeline_mode = #tpu.pipeline_mode<synchronous>, transform_indices = @transform_3, window_bounds = array<i64: 64, 64>}, {pipeline_mode = #tpu.pipeline_mode<synchronous>, transform_indices = @transform_4, window_bounds = array<i64: 1, 64>}, {pipeline_mode = #tpu.pipeline_mode<synchronous>, transform_indices = @transform_5, window_bounds = array<i64: 64, 16>}, {pipeline_mode = #tpu.pipeline_mode<synchronous>, transform_indices = @transform_6, window_bounds = array<i64: 32, 256>}, {pipeline_mode = #tpu.pipeline_mode<synchronous>, transform_indices = @transform_7, window_bounds = array<i64: 16, 128>}, {pipeline_mode = #tpu.pipeline_mode<synchronous>, transform_indices = @transform_8, window_bounds = array<i64: 16, 16>}]} {
    %c0 = arith.constant 0 : index
    %c0_0 = arith.constant 0 : index
    %0 = vector.load %arg1[%c0, %c0_0] : memref<16x16xbf16, #tpu.memory_space<vmem>>, vector<16x16xbf16>
    %c0_1 = arith.constant 0 : index
    %c0_2 = arith.constant 0 : index
    %1 = vector.load %arg2[%c0_1, %c0_2] : memref<16x64xbf16, #tpu.memory_space<vmem>>, vector<16x64xbf16>
    %cst = arith.constant dense<0.000000e+00> : vector<16x64xf32>
    %2 = tpu.matmul %0, %1, %cst {dimension_numbers = #tpu.dot_dimension_numbers<[1], [0], [0], [1], [0, 0, 1, 1], [], []>} : vector<16x16xbf16>, vector<16x64xbf16>, vector<16x64xf32> -> vector<16x64xf32>
    %c0_3 = arith.constant 0 : index
    %c0_4 = arith.constant 0 : index
    %3 = vector.load %arg3[%c0_3, %c0_4] : memref<1x64xf32, #tpu.memory_space<vmem>>, vector<1x64xf32>
    %4 = vector.broadcast %3 : vector<1x64xf32> to vector<16x64xf32>
    %5 = arith.addf %2, %4 : vector<16x64xf32>
    %cst_5 = arith.constant 0.000000e+00 : f32
    %6 = vector.broadcast %cst_5 : f32 to vector<16x64xf32>
    %7 = arith.maximumf %5, %6 : vector<16x64xf32>
    %8 = arith.truncf %7 : vector<16x64xf32> to vector<16x64xbf16>
    %c0_6 = arith.constant 0 : index
    %c0_7 = arith.constant 0 : index
    %9 = vector.load %arg4[%c0_6, %c0_7] : memref<64x64xbf16, #tpu.memory_space<vmem>>, vector<64x64xbf16>
    %cst_8 = arith.constant dense<0.000000e+00> : vector<16x64xf32>
    %10 = tpu.matmul %8, %9, %cst_8 {dimension_numbers = #tpu.dot_dimension_numbers<[1], [0], [0], [1], [0, 0, 1, 1], [], []>} : vector<16x64xbf16>, vector<64x64xbf16>, vector<16x64xf32> -> vector<16x64xf32>
    %c0_9 = arith.constant 0 : index
    %c0_10 = arith.constant 0 : index
    %11 = vector.load %arg5[%c0_9, %c0_10] : memref<1x64xf32, #tpu.memory_space<vmem>>, vector<1x64xf32>
    %12 = vector.broadcast %11 : vector<1x64xf32> to vector<16x64xf32>
    %13 = arith.addf %10, %12 : vector<16x64xf32>
    %14 = arith.truncf %13 : vector<16x64xf32> to vector<16x64xbf16>
    %15 = vector.extract_strided_slice %14 {offsets = [0, 0], sizes = [16, 32], strides = [1, 1]} : vector<16x64xbf16> to vector<16x32xbf16>
    %16 = vector.extract_strided_slice %14 {offsets = [0, 32], sizes = [16, 32], strides = [1, 1]} : vector<16x64xbf16> to vector<16x32xbf16>
    %c0_11 = arith.constant 0 : index
    %c0_12 = arith.constant 0 : index
    %17 = vector.load %arg6[%c0_11, %c0_12] : memref<64x16xbf16, #tpu.memory_space<vmem>>, vector<64x16xbf16>
    %cst_13 = arith.constant dense<0.000000e+00> : vector<16x16xf32>
    %18 = tpu.matmul %14, %17, %cst_13 {dimension_numbers = #tpu.dot_dimension_numbers<[1], [0], [0], [1], [0, 0, 1, 1], [], []>} : vector<16x64xbf16>, vector<64x16xbf16>, vector<16x16xf32> -> vector<16x16xf32>
    %c0_14 = arith.constant 0 : index
    %c0_15 = arith.constant 0 : index
    %19 = vector.load %arg9[%c0_14, %c0_15] : memref<16x16xf32, #tpu.memory_space<vmem>>, vector<16x16xf32>
    tpu.vector_store %arg9[%c0_14, %c0_15], %18 {strides = array<i32>} : memref<16x16xf32, #tpu.memory_space<vmem>>, vector<16x16xf32>,
    %c0_16 = arith.constant 0 : index
    %c0_17 = arith.constant 0 : index
    %20 = vector.load %arg7[%c0_16, %c0_17] : memref<32x256xbf16, #tpu.memory_space<vmem>>, vector<32x256xbf16>
    %cst_18 = arith.constant dense<0.000000e+00> : vector<16x256xf32>
    %21 = tpu.matmul %15, %20, %cst_18 {dimension_numbers = #tpu.dot_dimension_numbers<[1], [0], [0], [1], [0, 0, 1, 1], [], []>} : vector<16x32xbf16>, vector<32x256xbf16>, vector<16x256xf32> -> vector<16x256xf32>
    %22 = arith.truncf %21 : vector<16x256xf32> to vector<16x256xbf16>
    %cst_19 = arith.constant 0.000000e+00 : bf16
    %23 = vector.broadcast %cst_19 : bf16 to vector<128x256xbf16>
    %c0_20 = arith.constant 0 : index
    %c0_21 = arith.constant 0 : index
    %24 = vector.load %arg10[%c0_20, %c0_21] : memref<128x256xbf16, #tpu.memory_space<vmem>>, vector<128x256xbf16>
    tpu.vector_store %arg10[%c0_20, %c0_21], %23 {strides = array<i32>} : memref<128x256xbf16, #tpu.memory_space<vmem>>, vector<128x256xbf16>,
    %c0_22 = arith.constant 0 : index
    %c0_23 = arith.constant 0 : index
    %25 = vector.load %arg10[%c0_22, %c0_23] : memref<128x256xbf16, #tpu.memory_space<vmem>>, vector<16x32xbf16>
    tpu.vector_store %arg10[%c0_22, %c0_23], %16 {strides = array<i32>} : memref<128x256xbf16, #tpu.memory_space<vmem>>, vector<16x32xbf16>,
    %c16 = arith.constant 16 : index
    %c32 = arith.constant 32 : index
    %26 = vector.load %arg10[%c16, %c32] : memref<128x256xbf16, #tpu.memory_space<vmem>>, vector<16x32xbf16>
    tpu.vector_store %arg10[%c16, %c32], %16 {strides = array<i32>} : memref<128x256xbf16, #tpu.memory_space<vmem>>, vector<16x32xbf16>,
    %c32_24 = arith.constant 32 : index
    %c64 = arith.constant 64 : index
    %27 = vector.load %arg10[%c32_24, %c64] : memref<128x256xbf16, #tpu.memory_space<vmem>>, vector<16x32xbf16>
    tpu.vector_store %arg10[%c32_24, %c64], %16 {strides = array<i32>} : memref<128x256xbf16, #tpu.memory_space<vmem>>, vector<16x32xbf16>,
    %c48 = arith.constant 48 : index
    %c96 = arith.constant 96 : index
    %28 = vector.load %arg10[%c48, %c96] : memref<128x256xbf16, #tpu.memory_space<vmem>>, vector<16x32xbf16>
    tpu.vector_store %arg10[%c48, %c96], %16 {strides = array<i32>} : memref<128x256xbf16, #tpu.memory_space<vmem>>, vector<16x32xbf16>,
    %c64_25 = arith.constant 64 : index
    %c128 = arith.constant 128 : index
    %29 = vector.load %arg10[%c64_25, %c128] : memref<128x256xbf16, #tpu.memory_space<vmem>>, vector<16x32xbf16>
    tpu.vector_store %arg10[%c64_25, %c128], %16 {strides = array<i32>} : memref<128x256xbf16, #tpu.memory_space<vmem>>, vector<16x32xbf16>,
    %c80 = arith.constant 80 : index
    %c160 = arith.constant 160 : index
    %30 = vector.load %arg10[%c80, %c160] : memref<128x256xbf16, #tpu.memory_space<vmem>>, vector<16x32xbf16>
    tpu.vector_store %arg10[%c80, %c160], %16 {strides = array<i32>} : memref<128x256xbf16, #tpu.memory_space<vmem>>, vector<16x32xbf16>,
    %c96_26 = arith.constant 96 : index
    %c192 = arith.constant 192 : index
    %31 = vector.load %arg10[%c96_26, %c192] : memref<128x256xbf16, #tpu.memory_space<vmem>>, vector<16x32xbf16>
    tpu.vector_store %arg10[%c96_26, %c192], %16 {strides = array<i32>} : memref<128x256xbf16, #tpu.memory_space<vmem>>, vector<16x32xbf16>,
    %c112 = arith.constant 112 : index
    %c224 = arith.constant 224 : index
    %32 = vector.load %arg10[%c112, %c224] : memref<128x256xbf16, #tpu.memory_space<vmem>>, vector<16x32xbf16>
    tpu.vector_store %arg10[%c112, %c224], %16 {strides = array<i32>} : memref<128x256xbf16, #tpu.memory_space<vmem>>, vector<16x32xbf16>,
    %c0_27 = arith.constant 0 : index
    %c0_28 = arith.constant 0 : index
    %33 = vector.load %arg10[%c0_27, %c0_28] : memref<128x256xbf16, #tpu.memory_space<vmem>>, vector<128x256xbf16>
    %cst_29 = arith.constant dense<0.000000e+00> : vector<16x128xf32>
    %34 = tpu.matmul %22, %33, %cst_29 {dimension_numbers = #tpu.dot_dimension_numbers<[1], [1], [0], [0], [0, 0, 1, 0], [], []>} : vector<16x256xbf16>, vector<128x256xbf16>, vector<16x128xf32> -> vector<16x128xf32>
    %c0_30 = arith.constant 0 : index
    %c0_31 = arith.constant 0 : index
    %35 = vector.load %arg8[%c0_30, %c0_31] : memref<16x128xf32, #tpu.memory_space<vmem>>, vector<16x128xf32>
    tpu.vector_store %arg8[%c0_30, %c0_31], %34 {strides = array<i32>} : memref<16x128xf32, #tpu.memory_space<vmem>>, vector<16x128xf32>,
    return
  }
  func.func @transform_0(%arg0: i32) -> (i32, i32) {
    %c0_i32 = arith.constant 0 : i32
    %c0_i32_0 = arith.constant 0 : i32
    %c0_i32_1 = arith.constant 0 : i32
    return %c0_i32, %c0_i32_0 : i32, i32
  }
  func.func @transform_1(%arg0: i32) -> (i32, i32) {
    %c0_i32 = arith.constant 0 : i32
    %c0_i32_0 = arith.constant 0 : i32
    %c0_i32_1 = arith.constant 0 : i32
    return %c0_i32, %c0_i32_0 : i32, i32
  }
  func.func @transform_2(%arg0: i32) -> (i32, i32) {
    %c0_i32 = arith.constant 0 : i32
    %c0_i32_0 = arith.constant 0 : i32
    %c0_i32_1 = arith.constant 0 : i32
    return %c0_i32, %c0_i32_0 : i32, i32
  }
  func.func @transform_3(%arg0: i32) -> (i32, i32) {
    %c0_i32 = arith.constant 0 : i32
    %c0_i32_0 = arith.constant 0 : i32
    %c0_i32_1 = arith.constant 0 : i32
    return %c0_i32, %c0_i32_0 : i32, i32
  }
  func.func @transform_4(%arg0: i32) -> (i32, i32) {
    %c0_i32 = arith.constant 0 : i32
    %c0_i32_0 = arith.constant 0 : i32
    %c0_i32_1 = arith.constant 0 : i32
    return %c0_i32, %c0_i32_0 : i32, i32
  }
  func.func @transform_5(%arg0: i32) -> (i32, i32) {
    %c0_i32 = arith.constant 0 : i32
    %c0_i32_0 = arith.constant 0 : i32
    %c0_i32_1 = arith.constant 0 : i32
    return %c0_i32, %c0_i32_0 : i32, i32
  }
  func.func @transform_6(%arg0: i32) -> (i32, i32) {
    %c0_i32 = arith.constant 0 : i32
    %c0_i32_0 = arith.constant 0 : i32
    %c0_i32_1 = arith.constant 0 : i32
    return %c0_i32, %c0_i32_0 : i32, i32
  }
  func.func @transform_7(%arg0: i32) -> (i32, i32) {
    %c0_i32 = arith.constant 0 : i32
    %c0_i32_0 = arith.constant 0 : i32
    %c0_i32_1 = arith.constant 0 : i32
    return %c0_i32, %c0_i32_0 : i32, i32
  }
  func.func @transform_8(%arg0: i32) -> (i32, i32) {
    %c0_i32 = arith.constant 0 : i32
    %c0_i32_0 = arith.constant 0 : i32
    %c0_i32_1 = arith.constant 0 : i32
    return %c0_i32, %c0_i32_0 : i32, i32
  }
}

</mosaic_0001>

<bundles_post_ra>
// kernel: re_module_forward.1
= control target key start
LH: loop header
LB: loop body
LE: loop exit
PB: predicated region body
PF: predicated region fallthrough
CT: control target
= control target key end

     0   :  { %v522_v0 = vmov 0.0   ;;  %vm523_vm0 = vmmov 0   ;;  %vm51_vm1 = vcmask 130048   ;;  %vm138_vm2 = vcmask 523264   ;;  %s525_s30 = smov 64   ;;  %s527_s11 = smov 32   ;;  %s658_s1 = inlined_call_operand.vmem [shape: bf16[16,64], index: 1, kind: input, shape index: {}]   ;;  %s659_s0 = inlined_call_operand.vmem [shape: bf16[16,16], index: 0, kind: input, shape index: {}]   ;;  %s660_s3 = inlined_call_operand.vmem [shape: bf16[64,64], index: 3, kind: input, shape index: {}]   ;;  %s661_s5 = inlined_call_operand.vmem [shape: bf16[64,16], index: 5, kind: input, shape index: {}]   ;;  %s662_s2 = inlined_call_operand.vmem [shape: f32[1,64], index: 2, kind: input, shape index: {}]   ;;  %s663_s6 = inlined_call_operand.vmem [shape: bf16[32,256], index: 6, kind: input, shape index: {}]   ;;  %s664_s4 = inlined_call_operand.vmem [shape: f32[1,64], index: 4, kind: input, shape index: {}]   ;;  %s665_s8 = inlined_call_operand.vmem [shape: f32[16,16], index: 8, kind: output, shape index: {1}]   ;;  %s666_s7 = inlined_call_operand.vmem [shape: f32[16,128], index: 7, kind: output, shape index: {0}]  }
   0x1   :  { %470 = vmatprep.subr.bf16.mxu1 %v522_v0  ;;  %v506_v1 = vld [vmem:[%s658_s1] sm:$0xff]   ;;  %472 = vmatprep.mubr.msk.bf16.mxu1 %vm523_vm0, %v522_v0  ;;  %v509_v4 = vld [vmem:[%s660_s3 + $0x8] sm:$0xff]   ;;  %v510_v5 = vld [vmem:[%s660_s3 + $0x10] sm:$0xff]   ;;  %v524_v22 = vmov 0   ;;  %vm355_vm3 = vcmask 523520   ;;  %vm286_vm4 = vcmask 261120  }
   0x2   :  { %v507_v2 = vld [vmem:[%s659_s0] sm:$0xff]   ;;  %471 = vmatpush3.bf16.msra.mxu1 %v506_v1  ;;  %v511_v6 = vld [vmem:[%s660_s3 + $0x18] sm:$0xff]   ;;  %v513_v18 = vld [vmem:[%s661_s5 + $0x8] sm:$0xff]   ;;  %336 = vst [vmem:[#allocation2 + $0x10] sm:$0xff] %v524_v22  ;;  %387 = vmatprep.subr.bf16.mxu0 %v524_v22  ;;  %vm365_vm5 = vcmask 1048320   ;;  %vm360_vm6 = vcmask 785920  }
   0x3   :  { %v508_v3 = vld [vmem:[%s660_s3] sm:$0xff]   ;;  %476 = vmatprep.subr.bf16.mxu1 %v522_v0  ;;  %v514_v19 = vld [vmem:[%s661_s5 + $0x10] sm:$0xff]   ;;  %v515_v20 = vld [vmem:[%s661_s5 + $0x18] sm:$0xff]   ;;  %345 = vst [vmem:[#allocation2 + $0x58] sm:$0xff] %v524_v22 }
   0x4   :  { %v438_v7 = vld [vmem:[%s662_s2] ss:$0 sm:$0xff]  ;;  %v518_v21 = vld [vmem:[%s663_s6 + $0x4] ss:$8 sps:$4 sm:$0xff]   ;;  %334 = vst [vmem:[#allocation2] sm:$0xff] %v524_v22  ;;  %338 = vst [vmem:[#allocation2 + $0x20] sm:$0xff] %v524_v22 }
   0x5   :  { %473 = vmatmul.mubr.msk.bf16.vlgmr.msra.gmra.mrb[0].mxu1 %vm51_vm1, %v507_v2  ;;  %v512_v16 = vld [vmem:[%s661_s5] sm:$0xff]   ;;  %340 = vst [vmem:[#allocation2 + $0x30] sm:$0xff] %v524_v22  ;;  %343 = vst [vmem:[#allocation2 + $0x48] sm:$0xff] %v524_v22  ;;  %v521_v32 = vld [vmem:[%s663_s6 + $0x14] ss:$8 sps:$4 sm:$0xff]  }
   0x6   :  { %477 = vmatpush3.bf16.msra.mxu1 %v508_v3  ;;  %484 = vmatprep.mubr.msk.bf16.mxu1 %vm523_vm0, %v522_v0  ;;  %347 = vst [vmem:[#allocation2 + $0x68] sm:$0xff] %v524_v22  ;;  %349 = vst [vmem:[#allocation2 + $0x78] sm:$0xff] %v524_v22  ;;  %v442_v23 = vld [vmem:[%s664_s4] ss:$0 sm:$0xff]  ;;  %s526_s4 = smov 96  }
   0x7   :  { %478 = vmatprep.subr.bf16.mxu1 %v522_v0  ;;  %v516_v31 = vld [vmem:[%s663_s6] ss:$8 sps:$4 sm:$0xff]   ;;  %v519_v33 = vld [vmem:[%s663_s6 + $0x10] ss:$8 sps:$4 sm:$0xff]  }
   0xa   :  { %479 = vmatpush3.bf16.msra.mxu1 %v509_v4 }
   0xb   :  { %480 = vmatprep.subr.bf16.mxu1 %v522_v0 }
   0xe   :  { %481 = vmatpush3.bf16.msra.mxu1 %v510_v5 }
   0xf   :  { %482 = vmatprep.subr.bf16.mxu1 %v522_v0 }
  0x12   :  { %483 = vmatpush3.bf16.msra.mxu1 %v511_v6 }
  0x13   :  { %488 = vmatprep.subr.bf16.mxu1 %v522_v0 }
  0xd8   :  { %v89_v8 = vpop.f32.mrb[0].mxu1 }
  0xd9   :  { %v90_v9 = vadd.f32 %v438_v7, %v89_v8  ;;  %v474_v10 = vpop.f32.mrb[1].mxu1 }
  0xda   :  { %v92_v11 = vpop.f32.mrb[2].mxu1 }
  0xdb   :  { %v93_v12 = vadd.f32 %v438_v7, %v92_v11  ;;  %v475_v13 = vpop.f32.mrb[3].mxu1  ;;  %v96_v14 = vmax.f32 %v90_v9, 0.0 }
  0xdd   :  { %v97_v15 = vmax.f32 %v93_v12, 0.0 }
  0xdf   :  { %v98_v17 = vpack.c.bf16 %v97_v15, %v96_v14 }
  0xe1   :  { %485 = vmatmul.mubr.msk.bf16.vlgmr.msra.gmra.mrb[4].mxu1 %vm138_vm2, %v98_v17 }
  0xe2   :  { %489 = vmatpush3.bf16.msra.mxu1 %v512_v16  ;;  %496 = vmatprep.mubr.msk.bf16.mxu1 %vm523_vm0, %v522_v0 }
  0xe3   :  { %490 = vmatprep.subr.bf16.mxu1 %v522_v0 }
  0xe6   :  { %491 = vmatpush3.bf16.msra.mxu1 %v513_v18 }
  0xe7   :  { %492 = vmatprep.subr.bf16.mxu1 %v522_v0 }
  0xea   :  { %493 = vmatpush3.bf16.msra.mxu1 %v514_v19 }
  0xeb   :  { %494 = vmatprep.subr.bf16.mxu1 %v522_v0 }
  0xee   :  { %495 = vmatpush3.bf16.msra.mxu1 %v515_v20 }
  0xef   :  { %289 = vmatprep.subr.bf16.mxu1 %v518_v21 }
 0x1b4   :  { %v176_v24 = vpop.f32.mrb[4].mxu1 }
 0x1b5   :  { %v486_v25 = vpop.f32.mrb[5].mxu1  ;;  %v177_v27 = vadd.f32 %v442_v23, %v176_v24 }
 0x1b6   :  { %v179_v26 = vpop.f32.mrb[6].mxu1 }
 0x1b7   :  { %v180_v28 = vadd.f32 %v442_v23, %v179_v26  ;;  %v487_v29 = vpop.f32.mrb[7].mxu1 }
 0x1b9   :  { %v183_v30 = vpack.c.bf16 %v180_v28, %v177_v27 }
 0x1bb   :  { %356 = vst.msk [vmem:[#allocation2 + $0x10] sm:$0xff] %vm355_vm3, %v183_v30  ;;  %368 = vst.msk [vmem:[#allocation2 + $0x58] sm:$0xff] %vm355_vm3, %v183_v30  ;;  %362 = vrot.lane.b32.xlu1 %v183_v30, %s525_s30  ;;  %351 = vrot.lane.b32.xlu0 %v183_v30, %s526_s4 }
 0x1bc   :  { %497 = vmatmul.mubr.msk.bf16.vlgmr.msra.gmra.mrb[8].mxu1 %vm138_vm2, %v183_v30 }
 0x1bd   :  { %290 = vmatpush1.bf16.msra.mxu1 %v516_v31  ;;  %321 = vmatprep.mubr.bf16.mxu1 %v524_v22 }
 0x1be   :  { %291 = vmatprep.subr.bf16.mxu1 %v521_v32 }
 0x1bf   :  { %357 = vrot.lane.b32.xlu0 %v183_v30, %s527_s11 }
 0x1c1   :  { %292 = vmatpush1.bf16.msra.mxu1 %v519_v33 }
 0x1c2   :  { %v373_v38 = vld [vmem:[#allocation2 + $0x10] sm:$0xff]  ;;  %v382_v42 = vld [vmem:[#allocation2 + $0x58] sm:$0xff] }
 0x1c4   :  { %457 = vmatmul.mubr.msk.bf16.vlgmr.msra.gmra.mrb[12].mxu1 %vm286_vm4, %v183_v30 }
 0x22d   :  { %v363_v34 = vpop.permute.xlu1 %362  ;;  %v352_v35 = vpop.permute.xlu0 %351 }
 0x22e   :  { %366 = vst.msk [vmem:[#allocation2 + $0x30] sm:$0xff] %vm365_vm5, %v363_v34  ;;  %370 = vst.msk [vmem:[#allocation2 + $0x78] sm:$0xff] %vm365_vm5, %v363_v34 }
 0x22f   :  { %354 = vst.msk [vmem:[#allocation2] sm:$0xff] %vm286_vm4, %v352_v35  ;;  %367 = vst.msk [vmem:[#allocation2 + $0x48] sm:$0xff] %vm286_vm4, %v352_v35 }
 0x231   :  { %v358_v36 = vpop.permute.xlu0 %357 }
 0x232   :  { %361 = vst.msk [vmem:[#allocation2 + $0x20] sm:$0xff] %vm360_vm6, %v358_v36  ;;  %369 = vst.msk [vmem:[#allocation2 + $0x68] sm:$0xff] %vm360_vm6, %v358_v36 }
 0x235   :  { %v377_v40 = vld [vmem:[#allocation2 + $0x30] sm:$0xff]  ;;  %v386_v44 = vld [vmem:[#allocation2 + $0x78] sm:$0xff] }
 0x236   :  { %v371_v37 = vld [vmem:[#allocation2] sm:$0xff]  ;;  %v380_v41 = vld [vmem:[#allocation2 + $0x48] sm:$0xff] }
 0x237   :  { %388 = vmatpush1.bf16.xpose.msra.mxu0 %v371_v37 }
 0x238   :  { %389 = vmatprep.subr.bf16.mxu0 %v524_v22 }
 0x239   :  { %v375_v39 = vld [vmem:[#allocation2 + $0x20] sm:$0xff]  ;;  %v384_v43 = vld [vmem:[#allocation2 + $0x68] sm:$0xff] }
 0x23f   :  { %390 = vmatpush1.bf16.xpose.msra.mxu0 %v373_v38 }
 0x240   :  { %391 = vmatprep.subr.bf16.mxu0 %v524_v22 }
 0x247   :  { %392 = vmatpush1.bf16.xpose.msra.mxu0 %v375_v39 }
 0x248   :  { %393 = vmatprep.subr.bf16.mxu0 %v524_v22 }
 0x24f   :  { %394 = vmatpush1.bf16.xpose.msra.mxu0 %v377_v40 }
 0x250   :  { %395 = vmatprep.subr.bf16.mxu0 %v380_v41 }
 0x257   :  { %396 = vmatpush1.bf16.xpose.msra.mxu0 %v524_v22 }
 0x258   :  { %397 = vmatprep.subr.bf16.mxu0 %v382_v42 }
 0x25f   :  { %398 = vmatpush1.bf16.xpose.msra.mxu0 %v524_v22 }
 0x260   :  { %399 = vmatprep.subr.bf16.mxu0 %v384_v43 }
 0x267   :  { %400 = vmatpush1.bf16.xpose.msra.mxu0 %v524_v22 }
 0x268   :  { %401 = vmatprep.subr.bf16.mxu0 %v386_v44 }
 0x26f   :  { %402 = vmatpush1.bf16.xpose.msra.mxu0 %v524_v22 }
 0x28f   :  { %v253_v45 = vpop.f32.mrb[8].mxu1 }
 0x290   :  { %260 = vst.msk [vmem:[%s665_s8] sm:$0xff] %vm51_vm1, %v253_v45  ;;  %v498_v46 = vpop.f32.mrb[9].mxu1 }
 0x291   :  { %v256_v47 = vpop.f32.mrb[10].mxu1 }
 0x292   :  { %261 = vst.msk [vmem:[%s665_s8 + $0x8] sm:$0xff] %vm51_vm1, %v256_v47  ;;  %v499_v48 = vpop.f32.mrb[11].mxu1 }
 0x297   :  { %v323_v49 = vpop.f32.mrb[12].mxu1 }
 0x298   :  { %v325_v50 = vpop.f32.mrb[13].mxu1 }
 0x299   :  { %v327_v51 = vpop.f32.mrb[14].mxu1 }
 0x29a   :  { %v332_v52 = vpack.c.bf16 %v327_v51, %v323_v49  ;;  %v329_v53 = vpop.f32.mrb[15].mxu1 }
 0x29b   :  { %v333_v54 = vpack.c.bf16 %v329_v53, %v325_v50 }
 0x29d   :  { %419 = vmatprep.mubr.bf16.mxu0 %v333_v54 }
 0x29e   :  { %420 = vmatmul.mubr.bf16.vlgmr.msra.gmra.mrb[0].mxu0 %v332_v52 }
 0x371   :  { %v421_v55 = vpop.f32.mrb[0].mxu0 }
 0x372   :  { %428 = vst [vmem:[%s666_s7] sm:$0xff] %v421_v55  ;;  %v423_v56 = vpop.f32.mrb[1].mxu0 }
 0x373   :  { %v424_v57 = vpop.f32.mrb[2].mxu0 }
 0x374   :  { %429 = vst [vmem:[%s666_s7 + $0x8] sm:$0xff] %v424_v57  ;;  %v426_v58 = vpop.f32.mrb[3].mxu0 }

</bundles_post_ra>
